<compile_context>
chip_gen: v6e
topology: v6e:2x2x1
jax: 0.10.0
libtpu: 0.0.40
codegen_flags: <defaults>
</compile_context>

<pallas_src>
import functools

import jax
import jax.numpy as jnp
from jax.experimental import pallas as pl
from jax.experimental.pallas import tpu as pltpu


_TARGET_BLOCK_BYTES = 4 << 20   # ~4 MiB / block -> ~16 MiB double-buffered (in + out)
_VMEM_LIMIT_BYTES = 48 << 20    # > default scoped (16/32 MiB), < v7x 64 MiB physical


def _round_up(x, m):
    return (x + m - 1) // m * m


# --------------------- channels_last: reduce over last (lane) axis ---------------------

def _ln_rows_kernel(x_ref, w_ref, b_ref, o_ref, *, eps: float):
    # x_ref: (block_rows, C); w_ref/b_ref: (1, C)
    x = x_ref[...].astype(jnp.float32)
    u = jnp.mean(x, axis=-1, keepdims=True)            # mean over channels
    xc = x - u
    var = jnp.mean(xc * xc, axis=-1, keepdims=True)    # biased variance (torch semantics)
    inv = jax.lax.rsqrt(var + eps)
    w = w_ref[...].astype(jnp.float32)
    b = b_ref[...].astype(jnp.float32)
    o_ref[...] = (xc * inv * w + b).astype(o_ref.dtype)


def _layernorm_channels_last(x2d, weight, bias, eps, block_rows=None):
    """x2d: (R, C) -- normalize each row over C inside the Pallas kernel."""
    R, C = x2d.shape
    itemsize = x2d.dtype.itemsize
    if block_rows is None:
        # ~4 MiB per input block, clamped, multiple of 8, no bigger than (padded) R.
        block_rows = _TARGET_BLOCK_BYTES // max(1, C * itemsize)
        block_rows = _round_up(max(8, min(block_rows, 8192)), 8)
    block_rows = min(_round_up(block_rows, 8), _round_up(R, 8))
    grid = (pl.cdiv(R, block_rows),)   # partial tail block -> masked writes, no assert

    w2d = weight.reshape(1, C)
    b2d = bias.reshape(1, C)
    kernel = functools.partial(_ln_rows_kernel, eps=eps)
    # TODO(synk): for C < 128 (channels_last) the output lane axis is C, so stores are
    # partially masked; a lane-dense repack would need a different HBM output layout.
    return pl.pallas_call(
        kernel,
        out_shape=jax.ShapeDtypeStruct((R, C), x2d.dtype),
        grid_spec=pltpu.PrefetchScalarGridSpec(
            num_scalar_prefetch=0,
            grid=grid,
            in_specs=[
                pl.BlockSpec((block_rows, C), lambda i: (i, 0)),
                pl.BlockSpec((1, C), lambda i: (0, 0)),
                pl.BlockSpec((1, C), lambda i: (0, 0)),
            ],
            out_specs=pl.BlockSpec((block_rows, C), lambda i: (i, 0)),
        ),
        compiler_params=pltpu.CompilerParams(
            dimension_semantics=("parallel",),
            vmem_limit_bytes=_VMEM_LIMIT_BYTES,
        ),
    )(x2d, w2d, b2d)


# ------------------ channels_first: native NCHW, reduce over sublane axis ------------------

def _ln_cf_kernel(x_ref, w_ref, b_ref, o_ref, *, eps: float):
    # x_ref: (1, C, T) -- C on sublanes, spatial T on lanes; w_ref/b_ref: (C, 1)
    x = x_ref[...].astype(jnp.float32)
    u = jnp.mean(x, axis=1, keepdims=True)              # (1, 1, T): reduce over channels
    xc = x - u
    var = jnp.mean(xc * xc, axis=1, keepdims=True)
    inv = jax.lax.rsqrt(var + eps)
    w = w_ref[...].astype(jnp.float32)                  # (C, 1) broadcasts over spatial
    b = b_ref[...].astype(jnp.float32)
    o_ref[...] = (xc * inv * w + b).astype(o_ref.dtype)


def _layernorm_channels_first(x3d, weight, bias, eps, tile_hw=None):
    """x3d: (N, C, HW) -- per-position normalization over C, no layout transposes."""
    N, C, HW = x3d.shape
    itemsize = x3d.dtype.itemsize
    if tile_hw is None:
        tile_hw = _TARGET_BLOCK_BYTES // max(1, C * itemsize)
        tile_hw = _round_up(max(128, min(tile_hw, 1 << 17)), 128)
    tile_hw = min(_round_up(tile_hw, 128), _round_up(HW, 128))
    grid = (N, pl.cdiv(HW, tile_hw))   # partial tail block -> masked writes

    w2d = weight.reshape(C, 1)
    b2d = bias.reshape(C, 1)
    kernel = functools.partial(_ln_cf_kernel, eps=eps)
    return pl.pallas_call(
        kernel,
        out_shape=jax.ShapeDtypeStruct((N, C, HW), x3d.dtype),
        grid_spec=pltpu.PrefetchScalarGridSpec(
            num_scalar_prefetch=0,
            grid=grid,
            in_specs=[
                pl.BlockSpec((1, C, tile_hw), lambda n, j: (n, 0, j)),
                pl.BlockSpec((C, 1), lambda n, j: (0, 0)),
                pl.BlockSpec((C, 1), lambda n, j: (0, 0)),
            ],
            out_specs=pl.BlockSpec((1, C, tile_hw), lambda n, j: (n, 0, j)),
        ),
        compiler_params=pltpu.CompilerParams(
            dimension_semantics=("parallel", "parallel"),
            vmem_limit_bytes=_VMEM_LIMIT_BYTES,
        ),
    )(x3d, w2d, b2d)


# ---------------------------------- module wrapper ----------------------------------

class LayerNorm:
    """JAX/Pallas re-implementation of the ConvNeXt LayerNorm module."""

    def __init__(self, normalized_shape, eps=1e-6, data_format="channels_last",
                 weight=None, bias=None):
        if data_format not in ("channels_last", "channels_first"):
            raise NotImplementedError
        self.C = int(normalized_shape)
        self.eps = float(eps)
        self.data_format = data_format
        # Module defaults: ones / zeros.
        self.weight = jnp.ones((self.C,), jnp.float32) if weight is None else weight
        self.bias = jnp.zeros((self.C,), jnp.float32) if bias is None else bias

    def __call__(self, x, block_rows=None, tile_hw=None):
        if self.data_format == "channels_last":
            # x: (..., C)
            assert x.shape[-1] == self.C
            orig_shape = x.shape
            x2d = x.reshape(-1, self.C)
            y2d = _layernorm_channels_last(x2d, self.weight, self.bias, self.eps,
                                           block_rows=block_rows)
            return y2d.reshape(orig_shape)
        else:
            # channels_first: x is (N, C, *spatial) -- run natively, no transposes.
            assert x.shape[1] == self.C
            N, C = x.shape[0], x.shape[1]
            x3d = x.reshape(N, C, -1)                    # free reshape (contiguous)
            y3d = _layernorm_channels_first(x3d, self.weight, self.bias, self.eps,
                                            tile_hw=tile_hw)
            return y3d.reshape(x.shape)


# ------------------------------------ references ------------------------------------

def _ref_channels_first(x, w, b, eps):
    u = jnp.mean(x, axis=1, keepdims=True)
    s = jnp.mean((x - u) ** 2, axis=1, keepdims=True)
    xh = (x - u) / jnp.sqrt(s + eps)
    return w[None, :, None, None] * xh + b[None, :, None, None]


def _ref_channels_last(x, w, b, eps):
    u = jnp.mean(x, axis=-1, keepdims=True)
    s = jnp.mean((x - u) ** 2, axis=-1, keepdims=True)
    return (x - u) / jnp.sqrt(s + eps) * w + b


if __name__ == "__main__":
    key = jax.random.PRNGKey(0)
    k1, k2, k3, k4, k5, k6, k7 = jax.random.split(key, 7)
    eps = 1e-6

    # ---- channels_first case (NCHW conv feature map), C = 4 ----
    N, C, H, W = 2, 4, 16, 16
    x_cf = jax.random.normal(k1, (N, C, H, W), jnp.float32)
    w_cf = 1.0 + 0.1 * jax.random.normal(k2, (C,), jnp.float32)
    b_cf = 0.1 * jax.random.normal(k3, (C,), jnp.float32)
    ln_cf = LayerNorm(C, eps=eps, data_format="channels_first", weight=w_cf, bias=b_cf)
    y_cf = jax.block_until_ready(ln_cf(x_cf))
    ref_cf = _ref_channels_first(x_cf, w_cf, b_cf, eps)
    assert y_cf.shape == (N, C, H, W)
    assert jnp.max(jnp.abs(y_cf - ref_cf)) < 1e-4

    # ---- channels_first with H*W not a multiple of 128 (partial tail block) ----
    x_cf2 = jax.random.normal(k4, (2, 4, 9, 10), jnp.float32)
    y_cf2 = jax.block_until_ready(ln_cf(x_cf2))
    ref_cf2 = _ref_channels_first(x_cf2, w_cf, b_cf, eps)
    assert jnp.max(jnp.abs(y_cf2 - ref_cf2)) < 1e-4

    # ---- channels_last case (NHWC), C = 32 ----
    N2, H2, W2, C2 = 2, 8, 8, 32
    x_cl = jax.random.normal(k5, (N2, H2, W2, C2), jnp.float32)
    w_cl = jnp.ones((C2,), jnp.float32)
    b_cl = 0.05 * jax.random.normal(k6, (C2,), jnp.float32)
    ln_cl = LayerNorm(C2, eps=eps, data_format="channels_last", weight=w_cl, bias=b_cl)
    y_cl = jax.block_until_ready(ln_cl(x_cl))
    ref_cl = _ref_channels_last(x_cl, w_cl, b_cl, eps)
    assert y_cl.shape == (N2, H2, W2, C2)
    assert jnp.max(jnp.abs(y_cl - ref_cl)) < 1e-4

    # ---- channels_last with row count not a multiple of 8 (partial tail block) ----
    x_cl2 = jax.random.normal(k7, (3, 5, 7, C2), jnp.float32)   # R = 105
    y_cl2 = jax.block_until_ready(ln_cl(x_cl2))
    ref_cl2 = _ref_channels_last(x_cl2, w_cl, b_cl, eps)
    assert y_cl2.shape == (3, 5, 7, C2)
    assert jnp.max(jnp.abs(y_cl2 - ref_cl2)) < 1e-4

    print("KERNEL_OK")
</pallas_src>

<mosaic_0001>
module attributes {stable_mosaic.version = 11 : i64} {
  func.func @_ln_cf_kernel(%arg0: i32, %arg1: i32, %arg2: memref<1x4x256xf32, #tpu.memory_space<vmem>>, %arg3: memref<4x1xf32, #tpu.memory_space<vmem>>, %arg4: memref<4x1xf32, #tpu.memory_space<vmem>>, %arg5: memref<1x4x256xf32, #tpu.memory_space<vmem>>) attributes {dimension_semantics = [#tpu.dimension_semantics<parallel>, #tpu.dimension_semantics<parallel>], iteration_bounds = array<i64: 2, 1>, scalar_prefetch = 0 : i64, scratch_operands = 0 : i64, tpu.core_type = #tpu.core_type<tc>, window_params = [{transform_indices = @transform_0, window_bounds = array<i64: 1, 4, 256>}, {pipeline_mode = #tpu.pipeline_mode<synchronous>, transform_indices = @transform_1, window_bounds = array<i64: 4, 1>}, {pipeline_mode = #tpu.pipeline_mode<synchronous>, transform_indices = @transform_2, window_bounds = array<i64: 4, 1>}, {transform_indices = @transform_3, window_bounds = array<i64: 1, 4, 256>}]} {
    %c0 = arith.constant 0 : index
    %c0_0 = arith.constant 0 : index
    %c0_1 = arith.constant 0 : index
    %0 = vector.load %arg2[%c0, %c0_0, %c0_1] : memref<1x4x256xf32, #tpu.memory_space<vmem>>, vector<1x4x256xf32>
    %cst = arith.constant dense<0.000000e+00> : vector<1x256xf32>
    %1 = vector.multi_reduction <add>, %0, %cst [1] : vector<1x4x256xf32> to vector<1x256xf32>
    %2 = vector.shape_cast %1 : vector<1x256xf32> to vector<1x1x256xf32>
    %cst_2 = arith.constant 4.000000e+00 : f32
    %3 = vector.broadcast %cst_2 : f32 to vector<1x1x256xf32>
    %4 = arith.divf %2, %3 : vector<1x1x256xf32>
    %5 = vector.broadcast %4 : vector<1x1x256xf32> to vector<1x4x256xf32>
    %6 = arith.subf %0, %5 : vector<1x4x256xf32>
    %7 = arith.mulf %6, %6 : vector<1x4x256xf32>
    %cst_3 = arith.constant dense<0.000000e+00> : vector<1x256xf32>
    %8 = vector.multi_reduction <add>, %7, %cst_3 [1] : vector<1x4x256xf32> to vector<1x256xf32>
    %9 = vector.shape_cast %8 : vector<1x256xf32> to vector<1x1x256xf32>
    %cst_4 = arith.constant 4.000000e+00 : f32
    %10 = vector.broadcast %cst_4 : f32 to vector<1x1x256xf32>
    %11 = arith.divf %9, %10 : vector<1x1x256xf32>
    %cst_5 = arith.constant 9.99999997E-7 : f32
    %12 = vector.broadcast %cst_5 : f32 to vector<1x1x256xf32>
    %13 = arith.addf %11, %12 : vector<1x1x256xf32>
    %14 = math.rsqrt %13 : vector<1x1x256xf32>
    %c0_6 = arith.constant 0 : index
    %c0_7 = arith.constant 0 : index
    %15 = vector.load %arg3[%c0_6, %c0_7] : memref<4x1xf32, #tpu.memory_space<vmem>>, vector<4x1xf32>
    %c0_8 = arith.constant 0 : index
    %c0_9 = arith.constant 0 : index
    %16 = vector.load %arg4[%c0_8, %c0_9] : memref<4x1xf32, #tpu.memory_space<vmem>>, vector<4x1xf32>
    %17 = vector.broadcast %14 : vector<1x1x256xf32> to vector<1x4x256xf32>
    %18 = arith.mulf %6, %17 : vector<1x4x256xf32>
    %19 = vector.shape_cast %15 : vector<4x1xf32> to vector<1x4x1xf32>
    %20 = vector.broadcast %19 : vector<1x4x1xf32> to vector<1x4x256xf32>
    %21 = arith.mulf %18, %20 : vector<1x4x256xf32>
    %22 = vector.shape_cast %16 : vector<4x1xf32> to vector<1x4x1xf32>
    %23 = vector.broadcast %22 : vector<1x4x1xf32> to vector<1x4x256xf32>
    %24 = arith.addf %21, %23 : vector<1x4x256xf32>
    %c0_10 = arith.constant 0 : index
    %c0_11 = arith.constant 0 : index
    %c0_12 = arith.constant 0 : index
    %25 = vector.load %arg5[%c0_10, %c0_11, %c0_12] : memref<1x4x256xf32, #tpu.memory_space<vmem>>, vector<1x4x256xf32>
    tpu.vector_store %arg5[%c0_10, %c0_11, %c0_12], %24 {strides = array<i32>} : memref<1x4x256xf32, #tpu.memory_space<vmem>>, vector<1x4x256xf32>,
    return
  }
  func.func @transform_0(%arg0: i32, %arg1: i32) -> (i32, i32, i32) {
    %c0_i32 = arith.constant 0 : i32
    %c0_i32_0 = arith.constant 0 : i32
    return %arg0, %c0_i32, %arg1 : i32, i32, i32
  }
  func.func @transform_1(%arg0: i32, %arg1: i32) -> (i32, i32) {
    %c0_i32 = arith.constant 0 : i32
    %c0_i32_0 = arith.constant 0 : i32
    %c0_i32_1 = arith.constant 0 : i32
    return %c0_i32, %c0_i32_0 : i32, i32
  }
  func.func @transform_2(%arg0: i32, %arg1: i32) -> (i32, i32) {
    %c0_i32 = arith.constant 0 : i32
    %c0_i32_0 = arith.constant 0 : i32
    %c0_i32_1 = arith.constant 0 : i32
    return %c0_i32, %c0_i32_0 : i32, i32
  }
  func.func @transform_3(%arg0: i32, %arg1: i32) -> (i32, i32, i32) {
    %c0_i32 = arith.constant 0 : i32
    %c0_i32_0 = arith.constant 0 : i32
    return %arg0, %c0_i32, %arg1 : i32, i32, i32
  }
}

</mosaic_0001>

<bundles_post_ra>
// kernel: tpu_custom_call.1
= control target key start
LH: loop header
LB: loop body
LE: loop exit
PB: predicated region body
PF: predicated region fallthrough
CT: control target
= control target key end

     0   :  { %8 = vsyncpa [#allocation3], 0  ;;  %s762_s0 = inlined_call_operand.hbm [shape: f32[2,4,256], index: 0, kind: input, shape index: {}]   ;;  %s763_s1 = inlined_call_operand.vmem [shape: f32[4,1], index: 1, kind: input, shape index: {}]   ;;  %s764_s2 = inlined_call_operand.vmem [shape: f32[4,1], index: 2, kind: input, shape index: {}]   ;;  %s765_s3 = inlined_call_operand.hbm [shape: f32[2,4,256], index: 3, kind: output, shape index: {}]  }
   0x1   :  { %10 = vsyncpa [#allocation3 + $0x1], 0 }
   0x2   :  { %11 = vsyncpa [#allocation4], 0 }
   0x3   :  { %13 = vsyncpa [#allocation4 + $0x1], 0  ;;  %s614_s12 = smov 0   ;;  %s616_s13 = smov 0  }
   0x4   :  { %s618_s14 = smov 0   ;;  %s620_s15 = smov 0  }
   0x5   :  { %s622_s16 = smov 0   ;;  %s624_s17 = smov 0  }
   0x6 LB: > { %s393_s18 = sadd.s32 4294967295, %s588_s17   ;;  %s394_s19 = sadd.s32 4294967294, %s588_s17   ;;  %s588_s17 = sphi %s624_s17, %s19_s17   ;;  %s584_s16 = sphi %s622_s16, %s777_s16   ;;  %s580_s15 = sphi %s620_s15, %s776_s15   ;;  %s576_s14 = sphi %s618_s14, %s775_s14   ;;  %s572_s13 = sphi %s616_s13, %s774_s13   ;;  %s568_s12 = sphi %s614_s12, %s773_s12  }
   0x7   : > { %s31_s20 = sadd.s32 1, %s584_s16  ;;  %s40_s21 = sadd.s32 1, %s576_s14 }
   0x8   : > { %p33_p0 = scmp.ge.s32.totalorder %s31_s20, 2  ;;  %p47_p1 = scmp.ne.s32.totalorder %s576_s14, %s572_s13 }
   0x9   : > { %p48_p2 = scmp.eq.s32.totalorder %s588_s17, 0  ;;  %p53_p3 = scmp.ne.s32.totalorder %s572_s13, %s568_s12 }
   0xa   : > { %s779_s20 = smov (%p33_p0, %s31_s20), 0  ;;  %p54_p5 = scmp.eq.s32.totalorder %s393_s18, 0 }
   0xb   : > { %p655_p4 = por %p48_p2, %p47_p1  ;;  %s35_s23 = ssub.s32 %s584_s16, %s779_s20 }
   0xc   : > { %p121_p6 = scmp.eq.s32.totalorder %s393_s18, 1  ;;  %p38_p7 = scmp.eq.s32.totalorder %s35_s23, 0 }
   0xd   : > { %p661_p8 = por %p54_p5, %p53_p3  ;;  %p127_p10 = scmp.eq.s32.totalorder %s394_s19, 1 }
   0xe   : > { %p665_p9 = por %p121_p6, %p47_p1  ;;  %p422_p13 = scmp.lt.s32.totalorder %s588_s17, 2 }
   0xf   : > { %s670_s26 = scalar_select %p38_p7, %s576_s14, %s40_s21  }
  0x10   : > { %p672_p11 = por %p127_p10, %p53_p3  ;;  %s153_s28 = sand.u32 1, %s576_s14  }
  0x11   : > { %s397_s29 = sshll.u32 %s153_s28, 3  ;;  %s408_s30 = sshll.u32 %s584_s16, 7 }
  0x12   : > { %s769_s27 = scalar_select %p672_p11, 1, 0 }
  0x13   : > { %s165_s6 = scalar_lea.hbm %s762_s0, %s408_s30  ;;  %s157_s7 = scalar_lea.vmem [#allocation2], %s397_s29 }
  0x14   : > { %s167_s8 = sshll.u32 %s157_s7, 4  ;;  %p685_p0 = pnand %p422_p13, %p655_p4  ;;  %s168_s8 = int_to_ptr.vmem [resolvable:$true] %s167_s8 }
  0x15   : > { %p400_p1 = scmp.ge.s32.totalorder %s588_s17, 1  ;;  %p172_p2 = scmp.lt.s32.totalorder %s588_s17, 3 }
  0x16   : > { %s154_s10 = scalar_lea.sflag [#allocation3], %s153_s28  ;;  %p482_p3 = pneg %p685_p0 }
  0x17   : > { %s493_s11 = scalar_lea.vmem %s168_s8, 128  ;;  %s590_s18 = smov [#allocation2]  }
  0x18   : > { %p494_p5 = scmp.ne.s32.totalorder %s168_s8, %s493_s11  ;;  %s498_s19 = sshll.u32 %s590_s18, 4  ;;  %s499_s19 = int_to_ptr.vmem [resolvable:$false] %s498_s19 }
  0x19   : > { %s500_s21 = scalar_lea.vmem %s499_s19, 256  ;;  %p501_p10 = scmp.lt.s32.totalorder %s168_s8, %s499_s19 }
  0x1a   : > { %p496_p6 = pnand %p494_p5, %p482_p3  ;;  %p502_p12 = scmp.lt.s32.totalorder %s500_s21, %s493_s11 }
  0x1c   : > { %p497_p7 = pneg %p496_p6  ;;  %p503_p4 = por %p502_p12, %p501_p10 }
  0x1e   : > { %p504_p13 = pnand %p503_p4, %p497_p7 }
  0x20   : > { %507 = shalt.err (!%p504_p13)
}
  0x21   : > { %417 = dma.hbm_to_vmem [thread:$0]  (!%p685_p0), %s165_s6, 128, %s168_s8, %s154_s10  }
  0x22   : > { %p173_p11 = pnand %p400_p1, %p172_p2 }
  0x23   : > { %s700_s22 = sand.u32 (!%p173_p11), 1, %s572_s13  }
  0x24   : > { %176 = sbr.rel (%p173_p11) target bundleno = 189 (0xbd), region = 32  ;;  %s401_s23 = sshll.u32 (!%p173_p11), %s700_s22, 3 }
  0x25   : > { %s179_s28 = scalar_lea.sflag (!%p173_p11), [#allocation3], %s700_s22  ;;  %s182_s29 = scalar_lea.vmem (!%p173_p11), [#allocation2], %s401_s23 }
  0x29   : > { %559 = dma.done.wait (%p661_p8), %s179_s28, 128  }
  0x2a   : > { %561 = vsyncadd (%p661_p8), %s179_s28, 4294967168  ;;  %v591_v0 = vmov 0   ;;  %v258_v1 = vld [vmem:[%s763_s1] sm:$0xf]  ;;  %vm211_vm0 = vcmask 1043456   ;;  %v272_v45 = vlaneseq  ;;  %s409_s24 = sshll.u32 %s580_s15, 7 }
  0x2b   : > { %474 = vset.pattern.permute.xlu0 %v591_v0  ;;  %v259_v2 = vld [vmem:[%s764_s2] sm:$0xf]  ;;  %v592_v43 = vmov 839922192   ;;  %s204_s7 = scalar_lea.vmem [#allocation5], %s401_s23  ;;  %s307_s11 = scalar_lea.hbm %s765_s3, %s409_s24 }
  0x2c   : > { %267 = vperm.xlu0 %474, %v258_v1   ;;  %v207_v3 = vld [vmem:[%s182_s29] sm:$0xff]  ;;  %v270_v44 = vunpack.c.l.s4 %v592_v43  ;;  %v273_v48 = vshrl.u32 %v272_v45, 7  ;;  %s309_s8 = sshll.u32 %s204_s7, 4  ;;  %s293_s18 = scalar_lea.sflag [#allocation4], %s700_s22  ;;  %s310_s8 = int_to_ptr.vmem [resolvable:$true] %s309_s8 }
  0x2d   : > { %v209_v4 = vcombine.high %v207_v3, %v207_v3  ;;  %v212_v5 = vsel %vm211_vm0, %v207_v3, 0.0  ;;  %s508_s19 = scalar_lea.vmem %s310_s8, 128  ;;  %s593_s21 = smov [#allocation5]  }
  0x2e   : > { %v213_v7 = vrot.slane %v212_v5, 4  ;;  %v271_v47 = vunpack.c.0.s8 %v270_v44  ;;  %p509_p8 = scmp.ne.s32.totalorder %s310_s8, %s508_s19  ;;  %s512_s15 = sshll.u32 %s593_s21, 4  ;;  %s513_s15 = int_to_ptr.vmem [resolvable:$false] %s512_s15 }
  0x2f   : > { %v219_v6 = vsel %vm211_vm0, %v209_v4, 0.0  ;;  %s514_s23 = scalar_lea.vmem %s513_s15, 256  ;;  %p515_p0 = scmp.lt.s32.totalorder %s310_s8, %s513_s15 }
  0x30   : > { %280 = vperm.xlu0 %474, %v259_v2   ;;  %v220_v8 = vrot.slane %v219_v6, 4  ;;  %v214_v9 = vadd.f32 %v213_v7, %v212_v5  ;;  %v274_v50 = vsub.s32 %v271_v47, %v273_v48  ;;  %p510_p11 = pnand %p509_p8, %p665_p9  ;;  %p516_p1 = scmp.lt.s32.totalorder %s514_s23, %s508_s19 }
  0x32   : > { %v221_v10 = vadd.f32 %v220_v8, %v219_v6  ;;  %v215_v11 = vrot.slane %v214_v9, 2  ;;  %p511_p12 = pneg %p510_p11  ;;  %p517_p2 = por %p516_p1, %p515_p0 }
  0x34   : > { %v222_v12 = vrot.slane %v221_v10, 2  ;;  %v216_v13 = vadd.f32 %v215_v11, %v214_v9  ;;  %p518_p3 = pnand %p517_p2, %p511_p12 }
  0x36   : > { %v223_v14 = vadd.f32 %v222_v12, %v221_v10  ;;  %v217_v15 = vrot.slane %v216_v13, 1 }
  0x38   : > { %v224_v16 = vrot.slane %v223_v14, 1  ;;  %v218_v17 = vadd.f32 %v217_v15, %v216_v13 }
  0x3a   : > { %v225_v18 = vadd.f32 %v224_v16, %v223_v14  ;;  %v227_v19 = vmul.f32 0.25, %v218_v17 }
  0x3c   : > { %v228_v20 = vmul.f32 0.25, %v225_v18 }
  0x3e   : > { %v231_v21 = vcombine.low %v227_v19, %v228_v20 }
  0x40   : > { %v233_v22 = vsub.f32 %v207_v3, %v231_v21 }
  0x42   : > { %v234_v23 = vmul.f32 %v233_v22, %v233_v22 }
  0x44   : > { %v236_v24 = vcombine.high %v234_v23, %v234_v23  ;;  %v238_v25 = vsel %vm211_vm0, %v234_v23, 0.0 }
  0x45   : > { %v239_v27 = vrot.slane %v238_v25, 4 }
  0x46   : > { %v245_v26 = vsel %vm211_vm0, %v236_v24, 0.0 }
  0x47   : > { %v246_v28 = vrot.slane %v245_v26, 4  ;;  %v240_v29 = vadd.f32 %v239_v27, %v238_v25 }
  0x49   : > { %v247_v30 = vadd.f32 %v246_v28, %v245_v26  ;;  %v241_v31 = vrot.slane %v240_v29, 2 }
  0x4b   : > { %v248_v32 = vrot.slane %v247_v30, 2  ;;  %v242_v33 = vadd.f32 %v241_v31, %v240_v29 }
  0x4d   : > { %v249_v34 = vadd.f32 %v248_v32, %v247_v30  ;;  %v243_v35 = vrot.slane %v242_v33, 1 }
  0x4f   : > { %v250_v36 = vrot.slane %v249_v34, 1  ;;  %v244_v37 = vadd.f32 %v243_v35, %v242_v33 }
  0x51   : > { %v251_v38 = vadd.f32 %v250_v36, %v249_v34  ;;  %v252_v39 = vmul.f32 0.25, %v244_v37 }
  0x53   : > { %v253_v40 = vmul.f32 0.25, %v251_v38  ;;  %v254_v41 = vadd.f32 1e-06, %v252_v39 }
  0x55   : > { %v255_v42 = vadd.f32 1e-06, %v253_v40  ;;  %476 = vrsqrt.f32 %v254_v41 }
  0x57   : > { %478 = vrsqrt.f32 %v255_v42 }
  0x62   : > { %v477_v46 = vpop.eup %476 }
  0x64   : > { %v479_v49 = vpop.eup %478 }
  0x65   : > { %v262_v51 = vcombine.low %v477_v46, %v479_v49 }
  0x67   : > { %v264_v53 = vmul.f32 %v262_v51, %v233_v22 }
  0xa7   : > { %v268_v52 = vpop.permute.xlu0 %267 }
  0xa8   : > { %v275_v54 = vrot.slane %v268_v52, %v274_v50 }
  0xaa   : > { %v277_v56 = vmul.f32 %v275_v54, %v264_v53 }
  0xab   : > { %v281_v55 = vpop.permute.xlu0 %280 }
  0xac   : > { %v288_v57 = vrot.slane %v281_v55, %v274_v50 }
  0xae   : > { %v290_v58 = vadd.f32 %v288_v57, %v277_v56 }
  0xb0   : > { %291 = vst [vmem:[%s204_s7] sm:$0xff] %v290_v58 }
  0xb1   : > { %521 = shalt.err (!%p518_p3)
}
  0xb2   : > { %s522_s28 = scalar_lea.hbm %s307_s11, 128  ;;  %s526_s30 = scalar_lea.hbm %s765_s3, 256 }
  0xb3   : > { %p523_p5 = scmp.ne.s32.totalorder %s307_s11, %s522_s28  ;;  %p527_p10 = scmp.lt.s32.totalorder %s307_s11, %s765_s3 }
  0xb4   : > { %p528_p4 = scmp.lt.s32.totalorder %s526_s30, %s522_s28 }
  0xb5   : > { %p524_p6 = pnand %p523_p5, %p665_p9 }
  0xb6   : > { %p529_p13 = por %p528_p4, %p527_p10 }
  0xb7   : > { %p525_p7 = pneg %p524_p6 }
  0xb9   : > { %p530_p8 = pnand %p529_p13, %p525_p7 }
  0xbb   : > { %533 = shalt.err (!%p530_p8)
}
  0xbc   : > { %412 = dma.vmem_to_hbm [thread:$0]  (%p665_p9), %s310_s8, 128, %s307_s11, %s293_s18  }
  0xbd PF: > { %s321_s6 = sand.u32 1, %s568_s12   ;;  %p771_p11 = scmp.ne.s32.totalorder %s769_s27, 0 }
  0xbe   : > { %p772_p12 = scmp.ge.s32.totalorder %s588_s17, 2  ;;  %s322_s24 = scalar_lea.sflag [#allocation4], %s321_s6 }
  0xc0   : > { %p419_p0 = pnand %p772_p12, %p771_p11 }
  0xc2   : > { %p420_p1 = pneg %p419_p0 }
  0xc4   : > { %563 = dma.done.wait (%p420_p1), %s322_s24, 128  }
  0xc5   : > { %565 = vsyncadd (%p420_p1), %s322_s24, 4294967168  ;;  %s19_s17 = sadd.s32 1, %s588_s17   ;;  %s773_s12 = smov %s572_s13 }
  0xc6   : > { %p16_p2 = scmp.ge.s32.totalorder %s19_s17, 4   ;;  %s774_s13 = smov %s576_s14 }
  0xc7   : > { %s775_s14 = smov %s670_s26  ;;  %s776_s15 = smov %s584_s16 }
  0xc8   : > { %s777_s16 = smov %s779_s20  ;;  %18 = sbr.rel (!%p16_p2) target bundleno = 6 (0x6), region = 77 }
  0xcd   :  { %327 = vsyncpa [#allocation3], 1 }
  0xce   :  { %329 = vsyncpa [#allocation3 + $0x1], 1 }
  0xcf   :  { %330 = vsyncpa [#allocation4], 1 }
  0xd0   :  { %332 = vsyncpa [#allocation4 + $0x1], 1 }

</bundles_post_ra>
